<compile_context>
chip_gen: v6e
topology: v6e:2x2x1
jax: 0.10.0
libtpu: 0.0.40
codegen_flags: <defaults>
</compile_context>

<pallas_src>
import jax
import jax.numpy as jnp
from jax.experimental import pallas as pl
from jax.experimental.pallas import tpu as pltpu


_LANE_CANDIDATES = (8192, 4096, 2048, 1024, 512, 256, 128)
_TARGET_BLOCK_BYTES = 4 * 1024 * 1024     # ~4 MiB block: near-roofline on v5e/v6e/v7x
_VMEM_LIMIT_BYTES = 48 * 1024 * 1024      # 2 io x 2 bufs x 4 MiB << 48 MiB, fits v7x 64 MiB
_SPLIT_BYTES = 1 * 1024 * 1024            # force >= 2 grid steps above this (v7x dual-TC)


def _silu_kernel(x_ref, o_ref):
    x = x_ref[...].astype(jnp.float32)
    # VPU elementwise; sigmoid's exp / reciprocal go to the EUP slot.
    o_ref[...] = (x * jax.nn.sigmoid(x)).astype(o_ref.dtype)


def _pick_lanes(total):
    for lanes in _LANE_CANDIDATES:
        if total % lanes == 0:
            return lanes
    return None


def _round_up(v, m):
    return ((v + m - 1) // m) * m


def nonlinearity(x, *, jax_fallback_bytes=0):
    """Elementwise SiLU: x * sigmoid(x). Any shape; preserves shape & dtype."""
    orig_shape = x.shape
    total = x.size
    if total == 0:
        return x
    itemsize = jnp.dtype(x.dtype).itemsize
    total_bytes = total * itemsize

    # Optional tiny-tensor bypass: let XLA fuse the op into its neighbours.
    if total_bytes <= jax_fallback_bytes:
        return x * jax.nn.sigmoid(x)

    # Lane-dense factorization: last dim a multiple of 128 -> unmasked vst path.
    lanes = _pick_lanes(total)
    pad = 0
    if lanes is None:
        pad = (-total) % 128                  # zero-pad: silu(0) == 0, harmless
        lanes = _pick_lanes(total + pad)
    padded_total = total + pad
    N = lanes
    M = padded_total // N

    flat = x.reshape(-1)                      # contiguous reshape: layout plumbing only
    if pad:
        flat = jnp.pad(flat, (0, pad))
    x2 = flat.reshape(M, N)

    # Block sizing by byte budget (~4 MiB) to hit the HBM roofline while
    # amortizing the ~0.35 us per-grid-step overhead.
    rows_budget = max(1, _TARGET_BLOCK_BYTES // (N * itemsize))
    tm = min(M, rows_budget)
    if tm >= 8:
        tm -= tm % 8                          # keep sublane-aligned block rows

    # v7x has 2 TensorCores sharded along "parallel" grid axes: make sure a
    # non-tiny tensor is split into at least two blocks so both cores stream.
    if total_bytes > _SPLIT_BYTES and tm >= M:
        tm = min(M, max(8, _round_up(pl.cdiv(M, 2), 8)))

    grid_m = pl.cdiv(M, tm)

    out2 = pl.pallas_call(
        _silu_kernel,
        out_shape=jax.ShapeDtypeStruct((M, N), x.dtype),
        grid=(grid_m,),
        in_specs=[pl.BlockSpec((tm, N), lambda i: (i, 0))],
        out_specs=pl.BlockSpec((tm, N), lambda i: (i, 0)),
        compiler_params=pltpu.CompilerParams(
            dimension_semantics=("parallel",),
            vmem_limit_bytes=_VMEM_LIMIT_BYTES,
        ),
    )(x2)

    out_flat = out2.reshape(-1)
    if pad:
        out_flat = out_flat[:total]
    return out_flat.reshape(orig_shape)


def reference_silu(x):
    return x * jax.nn.sigmoid(x)


if __name__ == "__main__":
    key = jax.random.PRNGKey(0)
    k1, k2, k3, k4 = jax.random.split(key, 4)

    # Shapes consistent with the module's use on motion-VQVAE feature maps.
    x_a = jax.random.normal(k1, (2, 32, 256), jnp.float32)    # (B, C, T), 128-divisible
    x_b = jax.random.normal(k2, (2, 4, 16, 16), jnp.float32)  # generic 4-D activation
    x_c = jax.random.normal(k3, (3, 5, 7), jnp.float32)       # non-128-divisible (pad path)
    x_d = jax.random.normal(k4, (4, 256, 2048), jnp.float32)  # ~8 MiB -> multi-block grid

    outs = []
    for x in (x_a, x_b, x_c, x_d):
        outs.append(jax.block_until_ready(nonlinearity(x)))

    for x, out in zip((x_a, x_b, x_c, x_d), outs):
        ref = reference_silu(x)
        assert out.shape == x.shape and out.dtype == x.dtype
        assert jnp.allclose(out, ref, atol=1e-6, rtol=1e-6)

    print("KERNEL_OK")
</pallas_src>

<mosaic_0001>
module attributes {stable_mosaic.version = 11 : i64} {
  func.func @_silu_kernel(%arg0: i32, %arg1: memref<2x8192xf32, #tpu.memory_space<vmem>>, %arg2: memref<2x8192xf32, #tpu.memory_space<vmem>>) attributes {dimension_semantics = [#tpu.dimension_semantics<parallel>], iteration_bounds = array<i64: 1>, scalar_prefetch = 0 : i64, scratch_operands = 0 : i64, tpu.core_type = #tpu.core_type<tc>, window_params = [{transform_indices = @transform_0, window_bounds = array<i64: 2, 8192>}, {transform_indices = @transform_1, window_bounds = array<i64: 2, 8192>}]} {
    %c0 = arith.constant 0 : index
    %c0_0 = arith.constant 0 : index
    %0 = vector.load %arg1[%c0, %c0_0] : memref<2x8192xf32, #tpu.memory_space<vmem>>, vector<2x8192xf32>
    %1 = arith.negf %0 : vector<2x8192xf32>
    %2 = math.exp %1 : vector<2x8192xf32>
    %cst = arith.constant 1.000000e+00 : f32
    %3 = vector.broadcast %cst : f32 to vector<2x8192xf32>
    %4 = arith.addf %3, %2 : vector<2x8192xf32>
    %5 = arith.divf %3, %4 : vector<2x8192xf32>
    %6 = arith.mulf %0, %5 : vector<2x8192xf32>
    %c0_1 = arith.constant 0 : index
    %c0_2 = arith.constant 0 : index
    %7 = vector.load %arg2[%c0_1, %c0_2] : memref<2x8192xf32, #tpu.memory_space<vmem>>, vector<2x8192xf32>
    tpu.vector_store %arg2[%c0_1, %c0_2], %6 {strides = array<i32>} : memref<2x8192xf32, #tpu.memory_space<vmem>>, vector<2x8192xf32>,
    return
  }
  func.func @transform_0(%arg0: i32) -> (i32, i32) {
    %c0_i32 = arith.constant 0 : i32
    %c0_i32_0 = arith.constant 0 : i32
    return %arg0, %c0_i32 : i32, i32
  }
  func.func @transform_1(%arg0: i32) -> (i32, i32) {
    %c0_i32 = arith.constant 0 : i32
    %c0_i32_0 = arith.constant 0 : i32
    return %arg0, %c0_i32 : i32, i32
  }
}

</mosaic_0001>

<bundles_post_ra>
// kernel: tpu_custom_call.1
= control target key start
LH: loop header
LB: loop body
LE: loop exit
PB: predicated region body
PF: predicated region fallthrough
CT: control target
= control target key end

     0   :  { %6 = vsyncpa [#allocation3], 0  ;;  %s388_s0 = inlined_call_operand.hbm [shape: f32[2,8192], index: 0, kind: input, shape index: {}]   ;;  %s389_s1 = inlined_call_operand.hbm [shape: f32[2,8192], index: 1, kind: output, shape index: {}]  }
   0x1   :  { %7 = vsyncpa [#allocation4], 0  ;;  %s306_s6 = smov [#allocation2]  }
   0x2   :  { %s14_s7 = sshll.u32 %s306_s6, 4  ;;  %s15_s7 = int_to_ptr.vmem [resolvable:$true] %s14_s7 }
   0x3   :  { %s270_s8 = scalar_lea.vmem %s15_s7, 2048  ;;  %p275_p1 = scmp.lt.s32.totalorder %s15_s7, %s15_s7 }
   0x4   :  { %p271_p0 = scmp.ne.s32.totalorder %s15_s7, %s270_s8  ;;  %p276_p2 = scmp.lt.s32.totalorder %s270_s8, %s270_s8 }
   0x6   :  { %p277_p3 = por %p276_p2, %p275_p1 }
   0x8   :  { %p278_p4 = pnand %p277_p3, %p271_p0 }
   0xa   :  { %281 = shalt.err (!%p278_p4)
}
   0xb   :  { %17 = dma.hbm_to_vmem [thread:$0]  %s388_s0, 2048, %s15_s7, [#allocation3]  }
   0xc   :  { %302 = dma.done.wait [#allocation3], 2048  }
   0xd   :  { %303 = vsyncadd [#allocation3], 4294965248  ;;  %v321_v0 = vld [vmem:[#allocation2] sm:$0xff]  ;;  %v323_v1 = vld [vmem:[#allocation2 + $0x8] sm:$0xff]  ;;  %s307_s0 = smov [#allocation5]  }
   0xe   :  { %v325_v2 = vld [vmem:[#allocation2 + $0x10] sm:$0xff]  ;;  %v180_v3 = vmul.f32 -1.442695, %v321_v0  ;;  %v181_v4 = vmul.f32 -1.442695, %v323_v1  ;;  %v330_v6 = vld [vmem:[#allocation2 + $0x18] sm:$0xff] }
   0xf   :  { %v182_v5 = vmul.f32 -1.442695, %v325_v2  ;;  %v332_v7 = vld [vmem:[#allocation2 + $0x20] sm:$0xff]  ;;  %v334_v8 = vld [vmem:[#allocation2 + $0x28] sm:$0xff]  ;;  %v183_v9 = vmul.f32 -1.442695, %v330_v6 }
  0x10   :  { %198 = vpow2.f32 %v180_v3  ;;  %v184_v10 = vmul.f32 -1.442695, %v332_v7  ;;  %v185_v11 = vmul.f32 -1.442695, %v334_v8  ;;  %v339_v12 = vld [vmem:[#allocation2 + $0x30] sm:$0xff]  ;;  %v341_v13 = vld [vmem:[#allocation2 + $0x38] sm:$0xff] }
  0x11   :  { %200 = vpow2.f32 %v181_v4  ;;  %v343_v14 = vld [vmem:[#allocation2 + $0x40] sm:$0xff]  ;;  %v186_v15 = vmul.f32 -1.442695, %v339_v12  ;;  %v187_v16 = vmul.f32 -1.442695, %v341_v13  ;;  %v347_v17 = vld [vmem:[#allocation2 + $0x48] sm:$0xff] }
  0x12   :  { %202 = vpow2.f32 %v182_v5  ;;  %v349_v18 = vld [vmem:[#allocation2 + $0x50] sm:$0xff]  ;;  %v188_v19 = vmul.f32 -1.442695, %v343_v14  ;;  %v352_v20 = vld [vmem:[#allocation2 + $0x58] sm:$0xff]  ;;  %v189_v21 = vmul.f32 -1.442695, %v347_v17 }
  0x13   :  { %204 = vpow2.f32 %v183_v9  ;;  %v355_v22 = vld [vmem:[#allocation2 + $0x60] sm:$0xff]  ;;  %v190_v23 = vmul.f32 -1.442695, %v349_v18  ;;  %v358_v24 = vld [vmem:[#allocation2 + $0x68] sm:$0xff]  ;;  %v191_v25 = vmul.f32 -1.442695, %v352_v20 }
  0x14   :  { %206 = vpow2.f32 %v184_v10  ;;  %v361_v26 = vld [vmem:[#allocation2 + $0x70] sm:$0xff]  ;;  %v192_v27 = vmul.f32 -1.442695, %v355_v22  ;;  %v364_v28 = vld [vmem:[#allocation2 + $0x78] sm:$0xff]  ;;  %v193_v29 = vmul.f32 -1.442695, %v358_v24 }
  0x15   :  { %208 = vpow2.f32 %v185_v11  ;;  %v194_v30 = vmul.f32 -1.442695, %v361_v26  ;;  %v195_v31 = vmul.f32 -1.442695, %v364_v28  ;;  %s171_s11 = sshll.u32 %s307_s0, 4  ;;  %s172_s11 = int_to_ptr.vmem [resolvable:$true] %s171_s11 }
  0x16   :  { %210 = vpow2.f32 %v186_v15  ;;  %s282_s12 = scalar_lea.vmem %s172_s11, 2048  ;;  %p287_p6 = scmp.lt.s32.totalorder %s172_s11, %s172_s11 }
  0x17   :  { %212 = vpow2.f32 %v187_v16  ;;  %p283_p5 = scmp.ne.s32.totalorder %s172_s11, %s282_s12  ;;  %p288_p7 = scmp.lt.s32.totalorder %s282_s12, %s282_s12 }
  0x18   :  { %214 = vpow2.f32 %v188_v19 }
  0x19   :  { %216 = vpow2.f32 %v189_v21  ;;  %p289_p8 = por %p288_p7, %p287_p6 }
  0x1a   :  { %218 = vpow2.f32 %v190_v23 }
  0x1b   :  { %220 = vpow2.f32 %v191_v25  ;;  %p290_p9 = pnand %p289_p8, %p283_p5 }
  0x1c   :  { %222 = vpow2.f32 %v192_v27 }
  0x1d   :  { %v199_v32 = vpop.eup %198  ;;  %224 = vpow2.f32 %v193_v29 }
  0x1e   :  { %v201_v33 = vpop.eup %200  ;;  %v85_v34 = vadd.f32 1.0, %v199_v32  ;;  %226 = vpow2.f32 %v194_v30 }
  0x1f   :  { %v203_v35 = vpop.eup %202  ;;  %v86_v36 = vadd.f32 1.0, %v201_v33  ;;  %228 = vpow2.f32 %v195_v31 }
  0x20   :  { %v205_v37 = vpop.eup %204  ;;  %230 = vrcp.f32 %v85_v34  ;;  %v87_v38 = vadd.f32 1.0, %v203_v35 }
  0x21   :  { %v207_v39 = vpop.eup %206  ;;  %232 = vrcp.f32 %v86_v36  ;;  %v88_v40 = vadd.f32 1.0, %v205_v37 }
  0x22   :  { %v209_v41 = vpop.eup %208  ;;  %234 = vrcp.f32 %v87_v38  ;;  %v89_v42 = vadd.f32 1.0, %v207_v39 }
  0x23   :  { %v211_v43 = vpop.eup %210  ;;  %236 = vrcp.f32 %v88_v40  ;;  %v90_v44 = vadd.f32 1.0, %v209_v41 }
  0x24   :  { %v213_v45 = vpop.eup %212  ;;  %238 = vrcp.f32 %v89_v42  ;;  %v91_v46 = vadd.f32 1.0, %v211_v43 }
  0x25   :  { %v215_v47 = vpop.eup %214  ;;  %240 = vrcp.f32 %v90_v44  ;;  %v92_v48 = vadd.f32 1.0, %v213_v45 }
  0x26   :  { %v217_v49 = vpop.eup %216  ;;  %242 = vrcp.f32 %v91_v46  ;;  %v93_v50 = vadd.f32 1.0, %v215_v47 }
  0x27   :  { %v219_v51 = vpop.eup %218  ;;  %244 = vrcp.f32 %v92_v48  ;;  %v94_v52 = vadd.f32 1.0, %v217_v49 }
  0x28   :  { %v221_v53 = vpop.eup %220  ;;  %246 = vrcp.f32 %v93_v50  ;;  %v95_v54 = vadd.f32 1.0, %v219_v51 }
  0x29   :  { %v223_v55 = vpop.eup %222  ;;  %248 = vrcp.f32 %v94_v52  ;;  %v96_v56 = vadd.f32 1.0, %v221_v53 }
  0x2a   :  { %v225_v57 = vpop.eup %224  ;;  %250 = vrcp.f32 %v95_v54  ;;  %v97_v58 = vadd.f32 1.0, %v223_v55 }
  0x2b   :  { %v227_v59 = vpop.eup %226  ;;  %252 = vrcp.f32 %v96_v56  ;;  %v98_v60 = vadd.f32 1.0, %v225_v57 }
  0x2c   :  { %v229_v61 = vpop.eup %228  ;;  %254 = vrcp.f32 %v97_v58  ;;  %v99_v62 = vadd.f32 1.0, %v227_v59 }
  0x2d   :  { %v231_v63 = vpop.eup %230  ;;  %256 = vrcp.f32 %v98_v60  ;;  %v100_v3 = vadd.f32 1.0, %v229_v61 }
  0x2e   :  { %v233_v4 = vpop.eup %232  ;;  %v133_v5 = vmul.f32 %v231_v63, %v321_v0  ;;  %258 = vrcp.f32 %v99_v62 }
  0x2f   :  { %v235_v9 = vpop.eup %234  ;;  %v134_v10 = vmul.f32 %v233_v4, %v323_v1  ;;  %260 = vrcp.f32 %v100_v3 }
  0x30   :  { %v237_v11 = vpop.eup %236  ;;  %149 = vst [vmem:[#allocation5] sm:$0xff] %v133_v5  ;;  %v135_v15 = vmul.f32 %v235_v9, %v325_v2 }
  0x31   :  { %v239_v16 = vpop.eup %238  ;;  %150 = vst [vmem:[#allocation5 + $0x8] sm:$0xff] %v134_v10  ;;  %v136_v19 = vmul.f32 %v237_v11, %v330_v6 }
  0x32   :  { %v241_v21 = vpop.eup %240  ;;  %151 = vst [vmem:[#allocation5 + $0x10] sm:$0xff] %v135_v15  ;;  %v137_v23 = vmul.f32 %v239_v16, %v332_v7 }
  0x33   :  { %v243_v25 = vpop.eup %242  ;;  %152 = vst [vmem:[#allocation5 + $0x18] sm:$0xff] %v136_v19  ;;  %v138_v0 = vmul.f32 %v241_v21, %v334_v8 }
  0x34   :  { %v245_v27 = vpop.eup %244  ;;  %153 = vst [vmem:[#allocation5 + $0x20] sm:$0xff] %v137_v23  ;;  %v139_v1 = vmul.f32 %v243_v25, %v339_v12 }
  0x35   :  { %v247_v29 = vpop.eup %246  ;;  %154 = vst [vmem:[#allocation5 + $0x28] sm:$0xff] %v138_v0  ;;  %v140_v2 = vmul.f32 %v245_v27, %v341_v13 }
  0x36   :  { %v249_v30 = vpop.eup %248  ;;  %155 = vst [vmem:[#allocation5 + $0x30] sm:$0xff] %v139_v1  ;;  %v141_v6 = vmul.f32 %v247_v29, %v343_v14 }
  0x37   :  { %v251_v31 = vpop.eup %250  ;;  %156 = vst [vmem:[#allocation5 + $0x38] sm:$0xff] %v140_v2  ;;  %v142_v7 = vmul.f32 %v249_v30, %v347_v17 }
  0x38   :  { %v253_v32 = vpop.eup %252  ;;  %157 = vst [vmem:[#allocation5 + $0x40] sm:$0xff] %v141_v6  ;;  %v143_v8 = vmul.f32 %v251_v31, %v349_v18 }
  0x39   :  { %v255_v33 = vpop.eup %254  ;;  %158 = vst [vmem:[#allocation5 + $0x48] sm:$0xff] %v142_v7  ;;  %v144_v12 = vmul.f32 %v253_v32, %v352_v20 }
  0x3a   :  { %v257_v34 = vpop.eup %256  ;;  %159 = vst [vmem:[#allocation5 + $0x50] sm:$0xff] %v143_v8  ;;  %v145_v13 = vmul.f32 %v255_v33, %v355_v22 }
  0x3b   :  { %v259_v35 = vpop.eup %258  ;;  %160 = vst [vmem:[#allocation5 + $0x58] sm:$0xff] %v144_v12  ;;  %v146_v14 = vmul.f32 %v257_v34, %v358_v24 }
  0x3c   :  { %v261_v36 = vpop.eup %260  ;;  %161 = vst [vmem:[#allocation5 + $0x60] sm:$0xff] %v145_v13  ;;  %v147_v17 = vmul.f32 %v259_v35, %v361_v26 }
  0x3d   :  { %162 = vst [vmem:[#allocation5 + $0x68] sm:$0xff] %v146_v14  ;;  %v148_v18 = vmul.f32 %v261_v36, %v364_v28 }
  0x3e   :  { %163 = vst [vmem:[#allocation5 + $0x70] sm:$0xff] %v147_v17 }
  0x3f   :  { %164 = vst [vmem:[#allocation5 + $0x78] sm:$0xff] %v148_v18 }
  0x40   :  { %293 = shalt.err (!%p290_p9)
}
  0x41   :  { %174 = dma.vmem_to_hbm [thread:$0]  %s172_s11, 2048, %s389_s1, [#allocation4]  }
  0x42   :  { %304 = dma.done.wait [#allocation4], 2048  }
  0x43   :  { %305 = vsyncadd [#allocation4], 4294965248 }
  0x44   :  { %178 = vsyncpa [#allocation3], 1 }
  0x45   :  { %179 = vsyncpa [#allocation4], 1 }

</bundles_post_ra>
